<compile_context>
chip_gen: v7x
topology: tpu7x:2x2x1
jax: 0.10.0
libtpu: 0.0.40
codegen_flags: <defaults>
</compile_context>

<pallas_src>
import math
import jax
import jax.numpy as jnp
from jax import lax
from jax.experimental import pallas as pl
from jax.experimental.pallas import tpu as pltpu


def make_attention_kernel(n, dim):
    def kernel(x_ref, wq_ref, wk_ref, wv_ref, wout_ref, bout_ref, o_ref, acc_ref):
        h = pl.program_id(1)

        @pl.when(h == 0)
        def _init():
            # Start the per-batch accumulator from the output-projection bias.
            acc_ref[...] = jnp.broadcast_to(
                bout_ref[...].astype(jnp.float32), (n, dim))

        x = x_ref[0]                                   # (n, dim)
        cdt = x_ref.dtype                              # MXU operand dtype

        # Per-head projections; the softmax scale is pre-folded into wq.
        q = jnp.dot(x, wq_ref[0], preferred_element_type=jnp.float32)  # (n, d)
        k = jnp.dot(x, wk_ref[0], preferred_element_type=jnp.float32)  # (n, d)
        v = jnp.dot(x, wv_ref[0], preferred_element_type=jnp.float32)  # (n, d)

        # dots = q @ k^T, expressed as a contraction over the shared last axis
        # (no materialized transpose).
        s = lax.dot_general(q.astype(cdt), k.astype(cdt),
                            (((1,), (1,)), ((), ())),
                            preferred_element_type=jnp.float32)        # (n, n)

        # Numerically stable softmax with deferred normalization (f32 math).
        m = jnp.max(s, axis=-1, keepdims=True)
        e = jnp.exp(s - m)                                             # (n, n)
        l = jnp.sum(e, axis=-1, keepdims=True)                         # (n, 1)

        o_h = jnp.dot(e.astype(cdt), v.astype(cdt),
                      preferred_element_type=jnp.float32)              # (n, d)
        o_h = o_h * pl.reciprocal(l, approx=True)

        # Output projection for this head, accumulated over heads.
        acc_ref[...] += jnp.dot(o_h.astype(cdt), wout_ref[0],
                                preferred_element_type=jnp.float32)    # (n, dim)

        @pl.when(h == pl.num_programs(1) - 1)
        def _store():
            o_ref[0] = acc_ref[...].astype(o_ref.dtype)

    return kernel


def attention_pallas(x, w_qkv, w_out, b_out, heads, dim_head):
    """x: (b, n, dim). w_qkv: (3*inner, dim) torch layout (to_qkv.weight).
    w_out: (dim, inner) torch layout (to_out[0].weight). b_out: (dim,)."""
    b, n, dim = x.shape
    inner = heads * dim_head
    scale = dim ** (-0.5)       # NOTE: module uses dim**-0.5 (not dim_head**-0.5)

    # Weight re-layout (outside the kernel): per-head, pre-transposed for x @ w.
    def per_head_in(w):         # (inner, dim) -> (heads, dim, dim_head)
        return jnp.transpose(w.reshape(heads, dim_head, dim), (0, 2, 1))

    wq = per_head_in(w_qkv[:inner]) * scale      # fold softmax scale into Q proj
    wk = per_head_in(w_qkv[inner:2 * inner])
    wv = per_head_in(w_qkv[2 * inner:])
    wo = jnp.transpose(w_out).reshape(heads, dim_head, dim)   # (heads, d, dim)
    bo = b_out.reshape(1, dim)

    kernel = make_attention_kernel(n, dim)

    itemsize = jnp.dtype(x.dtype).itemsize
    flops = b * (2 * n * dim * 3 * inner           # qkv projections
                 + heads * 4 * n * n * dim_head    # QK^T and attn @ V
                 + 2 * n * inner * dim)            # output projection
    cost = pl.CostEstimate(
        flops=int(flops),
        transcendentals=int(b * heads * n * n),
        bytes_accessed=int(itemsize * (2 * b * n * dim + 4 * inner * dim + dim)))

    return pl.pallas_call(
        kernel,
        out_shape=jax.ShapeDtypeStruct((b, n, dim), x.dtype),
        grid_spec=pltpu.PrefetchScalarGridSpec(
            num_scalar_prefetch=0,
            grid=(b, heads),                        # head (reduction) axis innermost
            in_specs=[
                pl.BlockSpec((1, n, dim), lambda ib, ih: (ib, 0, 0)),         # x
                pl.BlockSpec((1, dim, dim_head), lambda ib, ih: (ih, 0, 0)),  # wq
                pl.BlockSpec((1, dim, dim_head), lambda ib, ih: (ih, 0, 0)),  # wk
                pl.BlockSpec((1, dim, dim_head), lambda ib, ih: (ih, 0, 0)),  # wv
                pl.BlockSpec((1, dim_head, dim), lambda ib, ih: (ih, 0, 0)),  # wo
                pl.BlockSpec((1, dim), lambda ib, ih: (0, 0)),                # bias
            ],
            out_specs=pl.BlockSpec((1, n, dim), lambda ib, ih: (ib, 0, 0)),
            scratch_shapes=[pltpu.VMEM((n, dim), jnp.float32)],
        ),
        compiler_params=pltpu.CompilerParams(
            dimension_semantics=("parallel", "arbitrary")),
        cost_estimate=cost,
    )(x, wq, wk, wv, wo, bo)


def attention_reference(x, w_qkv, w_out, b_out, heads, dim_head):
    b, n, dim = x.shape
    inner = heads * dim_head
    scale = dim ** (-0.5)
    qkv = x @ w_qkv.T                                   # (b, n, 3*inner)
    q, k, v = jnp.split(qkv, 3, axis=-1)

    def to_heads(t):
        return t.reshape(b, n, heads, dim_head).transpose(0, 2, 1, 3)

    q, k, v = map(to_heads, (q, k, v))
    dots = jnp.einsum('bhid,bhjd->bhij', q, k) * scale
    attn = jax.nn.softmax(dots, axis=-1)
    out = jnp.einsum('bhij,bhjd->bhid', attn, v)
    out = out.transpose(0, 2, 1, 3).reshape(b, n, inner)
    return out @ w_out.T + b_out


if __name__ == "__main__":
    batch, seq, dim = 2, 8, 32
    heads, dim_head = 4, 8
    inner = heads * dim_head

    key = jax.random.PRNGKey(0)
    kx, kq, ko, kb = jax.random.split(key, 4)

    x = jax.random.normal(kx, (batch, seq, dim), dtype=jnp.float32)

    # nn.Linear(dim, inner*3, bias=False): weight (3*inner, dim), y = x @ W^T.
    bound_qkv = 1.0 / math.sqrt(dim)
    w_qkv = jax.random.uniform(kq, (3 * inner, dim), jnp.float32,
                               -bound_qkv, bound_qkv)

    # nn.Linear(inner, dim) (bias=True): weight (dim, inner), bias (dim,).
    bound_out = 1.0 / math.sqrt(inner)
    w_out = jax.random.uniform(ko, (dim, inner), jnp.float32,
                               -bound_out, bound_out)
    b_out = jax.random.uniform(kb, (dim,), jnp.float32,
                               -bound_out, bound_out)

    out = attention_pallas(x, w_qkv, w_out, b_out, heads, dim_head)
    out = jax.block_until_ready(out)

    ref = attention_reference(x, w_qkv, w_out, b_out, heads, dim_head)
    assert out.shape == (batch, seq, dim)
    # approx reciprocal (EUP) -> slightly looser tolerance than pure f32.
    assert jnp.allclose(out, ref, atol=2e-3, rtol=2e-3), "mismatch vs reference"

    print("KERNEL_OK")
</pallas_src>

<mosaic_0001>
module attributes {stable_mosaic.version = 11 : i64} {
  func.func @kernel(%arg0: i32, %arg1: i32, %arg2: memref<1x8x32xf32, #tpu.memory_space<vmem>>, %arg3: memref<1x32x8xf32, #tpu.memory_space<vmem>>, %arg4: memref<1x32x8xf32, #tpu.memory_space<vmem>>, %arg5: memref<1x32x8xf32, #tpu.memory_space<vmem>>, %arg6: memref<1x8x32xf32, #tpu.memory_space<vmem>>, %arg7: memref<1x32xf32, #tpu.memory_space<vmem>>, %arg8: memref<1x8x32xf32, #tpu.memory_space<vmem>>, %arg9: memref<8x32xf32, #tpu.memory_space<vmem>>) attributes {dimension_semantics = [#tpu.dimension_semantics<parallel>, #tpu.dimension_semantics<arbitrary>], iteration_bounds = array<i64: 2, 4>, scalar_prefetch = 0 : i64, scratch_operands = 1 : i64, tpu.core_type = #tpu.core_type<tc>, window_params = [{transform_indices = @transform_0, window_bounds = array<i64: 1, 8, 32>}, {transform_indices = @transform_1, window_bounds = array<i64: 1, 32, 8>}, {transform_indices = @transform_2, window_bounds = array<i64: 1, 32, 8>}, {transform_indices = @transform_3, window_bounds = array<i64: 1, 32, 8>}, {transform_indices = @transform_4, window_bounds = array<i64: 1, 8, 32>}, {pipeline_mode = #tpu.pipeline_mode<synchronous>, transform_indices = @transform_5, window_bounds = array<i64: 1, 32>}, {transform_indices = @transform_6, window_bounds = array<i64: 1, 8, 32>}]} {
    %c0_i32 = arith.constant 0 : i32
    %0 = arith.cmpi eq, %arg1, %c0_i32 : i32
    %1 = arith.extui %0 : i1 to i32
    %c0_i32_0 = arith.constant 0 : i32
    %2 = arith.cmpi ne, %1, %c0_i32_0 : i32
    scf.if %2 {
      %c0_27 = arith.constant 0 : index
      %c0_28 = arith.constant 0 : index
      %35 = vector.load %arg7[%c0_27, %c0_28] : memref<1x32xf32, #tpu.memory_space<vmem>>, vector<1x32xf32>
      %36 = vector.shape_cast %35 : vector<1x32xf32> to vector<1x32xf32>
      %37 = vector.broadcast %36 : vector<1x32xf32> to vector<8x32xf32>
      %c0_29 = arith.constant 0 : index
      %c0_30 = arith.constant 0 : index
      %38 = vector.load %arg9[%c0_29, %c0_30] : memref<8x32xf32, #tpu.memory_space<vmem>>, vector<8x32xf32>
      tpu.vector_store %arg9[%c0_29, %c0_30], %37 {strides = array<i32>} : memref<8x32xf32, #tpu.memory_space<vmem>>, vector<8x32xf32>,
    } else {
    }
    %c0 = arith.constant 0 : index
    %c0_1 = arith.constant 0 : index
    %c0_2 = arith.constant 0 : index
    %3 = vector.load %arg2[%c0, %c0_1, %c0_2] : memref<1x8x32xf32, #tpu.memory_space<vmem>>, vector<1x8x32xf32>
    %4 = vector.shape_cast %3 : vector<1x8x32xf32> to vector<8x32xf32>
    %c0_3 = arith.constant 0 : index
    %c0_4 = arith.constant 0 : index
    %c0_5 = arith.constant 0 : index
    %5 = vector.load %arg3[%c0_3, %c0_4, %c0_5] : memref<1x32x8xf32, #tpu.memory_space<vmem>>, vector<1x32x8xf32>
    %6 = vector.shape_cast %5 : vector<1x32x8xf32> to vector<32x8xf32>
    %cst = arith.constant dense<0.000000e+00> : vector<8x8xf32>
    %7 = tpu.matmul %4, %6, %cst {dimension_numbers = #tpu.dot_dimension_numbers<[1], [0], [0], [1], [0, 0, 1, 1], [], []>} : vector<8x32xf32>, vector<32x8xf32>, vector<8x8xf32> -> vector<8x8xf32>
    %c0_6 = arith.constant 0 : index
    %c0_7 = arith.constant 0 : index
    %c0_8 = arith.constant 0 : index
    %8 = vector.load %arg4[%c0_6, %c0_7, %c0_8] : memref<1x32x8xf32, #tpu.memory_space<vmem>>, vector<1x32x8xf32>
    %9 = vector.shape_cast %8 : vector<1x32x8xf32> to vector<32x8xf32>
    %cst_9 = arith.constant dense<0.000000e+00> : vector<8x8xf32>
    %10 = tpu.matmul %4, %9, %cst_9 {dimension_numbers = #tpu.dot_dimension_numbers<[1], [0], [0], [1], [0, 0, 1, 1], [], []>} : vector<8x32xf32>, vector<32x8xf32>, vector<8x8xf32> -> vector<8x8xf32>
    %c0_10 = arith.constant 0 : index
    %c0_11 = arith.constant 0 : index
    %c0_12 = arith.constant 0 : index
    %11 = vector.load %arg5[%c0_10, %c0_11, %c0_12] : memref<1x32x8xf32, #tpu.memory_space<vmem>>, vector<1x32x8xf32>
    %12 = vector.shape_cast %11 : vector<1x32x8xf32> to vector<32x8xf32>
    %cst_13 = arith.constant dense<0.000000e+00> : vector<8x8xf32>
    %13 = tpu.matmul %4, %12, %cst_13 {dimension_numbers = #tpu.dot_dimension_numbers<[1], [0], [0], [1], [0, 0, 1, 1], [], []>} : vector<8x32xf32>, vector<32x8xf32>, vector<8x8xf32> -> vector<8x8xf32>
    %cst_14 = arith.constant dense<0.000000e+00> : vector<8x8xf32>
    %14 = tpu.matmul %7, %10, %cst_14 {dimension_numbers = #tpu.dot_dimension_numbers<[1], [1], [0], [0], [0, 0, 1, 0], [], []>} : vector<8x8xf32>, vector<8x8xf32>, vector<8x8xf32> -> vector<8x8xf32>
    %cst_15 = arith.constant dense<0xFF800000> : vector<8xf32>
    %15 = vector.multi_reduction <maximumf>, %14, %cst_15 [1] : vector<8x8xf32> to vector<8xf32>
    %16 = vector.shape_cast %15 : vector<8xf32> to vector<8x1xf32>
    %17 = vector.broadcast %16 : vector<8x1xf32> to vector<8x8xf32>
    %18 = arith.subf %14, %17 : vector<8x8xf32>
    %19 = math.exp %18 : vector<8x8xf32>
    %cst_16 = arith.constant dense<0.000000e+00> : vector<8xf32>
    %20 = vector.multi_reduction <add>, %19, %cst_16 [1] : vector<8x8xf32> to vector<8xf32>
    %21 = vector.shape_cast %20 : vector<8xf32> to vector<8x1xf32>
    %cst_17 = arith.constant dense<0.000000e+00> : vector<8x8xf32>
    %22 = tpu.matmul %19, %13, %cst_17 {dimension_numbers = #tpu.dot_dimension_numbers<[1], [0], [0], [1], [0, 0, 1, 1], [], []>} : vector<8x8xf32>, vector<8x8xf32>, vector<8x8xf32> -> vector<8x8xf32>
    %23 = tpu.reciprocal %21 {approx = true} : vector<8x1xf32> -> vector<8x1xf32>
    %24 = vector.broadcast %23 : vector<8x1xf32> to vector<8x8xf32>
    %25 = arith.mulf %22, %24 : vector<8x8xf32>
    %c0_18 = arith.constant 0 : index
    %c0_19 = arith.constant 0 : index
    %26 = vector.load %arg9[%c0_18, %c0_19] : memref<8x32xf32, #tpu.memory_space<vmem>>, vector<8x32xf32>
    %c0_20 = arith.constant 0 : index
    %c0_21 = arith.constant 0 : index
    %c0_22 = arith.constant 0 : index
    %27 = vector.load %arg6[%c0_20, %c0_21, %c0_22] : memref<1x8x32xf32, #tpu.memory_space<vmem>>, vector<1x8x32xf32>
    %28 = vector.shape_cast %27 : vector<1x8x32xf32> to vector<8x32xf32>
    %cst_23 = arith.constant dense<0.000000e+00> : vector<8x32xf32>
    %29 = tpu.matmul %25, %28, %cst_23 {dimension_numbers = #tpu.dot_dimension_numbers<[1], [0], [0], [1], [0, 0, 1, 1], [], []>} : vector<8x8xf32>, vector<8x32xf32>, vector<8x32xf32> -> vector<8x32xf32>
    %30 = arith.addf %26, %29 : vector<8x32xf32>
    %c0_24 = arith.constant 0 : index
    %c0_25 = arith.constant 0 : index
    %31 = vector.load %arg9[%c0_24, %c0_25] : memref<8x32xf32, #tpu.memory_space<vmem>>, vector<8x32xf32>
    tpu.vector_store %arg9[%c0_24, %c0_25], %30 {strides = array<i32>} : memref<8x32xf32, #tpu.memory_space<vmem>>, vector<8x32xf32>,
    %c3_i32 = arith.constant 3 : i32
    %32 = arith.cmpi eq, %arg1, %c3_i32 : i32
    %33 = arith.extui %32 : i1 to i32
    %c0_i32_26 = arith.constant 0 : i32
    %34 = arith.cmpi ne, %33, %c0_i32_26 : i32
    scf.if %34 {
      %c0_27 = arith.constant 0 : index
      %c0_28 = arith.constant 0 : index
      %35 = vector.load %arg9[%c0_27, %c0_28] : memref<8x32xf32, #tpu.memory_space<vmem>>, vector<8x32xf32>
      %c0_29 = arith.constant 0 : index
      %c0_30 = arith.constant 0 : index
      %c0_31 = arith.constant 0 : index
      %36 = vector.load %arg8[%c0_29, %c0_30, %c0_31] : memref<1x8x32xf32, #tpu.memory_space<vmem>>, vector<1x8x32xf32>
      %37 = vector.shape_cast %36 : vector<1x8x32xf32> to vector<8x32xf32>
      %38 = vector.shape_cast %35 : vector<8x32xf32> to vector<1x8x32xf32>
      tpu.vector_store %arg8[%c0_29, %c0_30, %c0_31], %38 {strides = array<i32>} : memref<1x8x32xf32, #tpu.memory_space<vmem>>, vector<1x8x32xf32>,
    } else {
    }
    return
  }
  func.func @transform_0(%arg0: i32, %arg1: i32) -> (i32, i32, i32) {
    %c0_i32 = arith.constant 0 : i32
    %c0_i32_0 = arith.constant 0 : i32
    %c0_i32_1 = arith.constant 0 : i32
    return %arg0, %c0_i32, %c0_i32_0 : i32, i32, i32
  }
  func.func @transform_1(%arg0: i32, %arg1: i32) -> (i32, i32, i32) {
    %c0_i32 = arith.constant 0 : i32
    %c0_i32_0 = arith.constant 0 : i32
    %c0_i32_1 = arith.constant 0 : i32
    return %arg1, %c0_i32, %c0_i32_0 : i32, i32, i32
  }
  func.func @transform_2(%arg0: i32, %arg1: i32) -> (i32, i32, i32) {
    %c0_i32 = arith.constant 0 : i32
    %c0_i32_0 = arith.constant 0 : i32
    %c0_i32_1 = arith.constant 0 : i32
    return %arg1, %c0_i32, %c0_i32_0 : i32, i32, i32
  }
  func.func @transform_3(%arg0: i32, %arg1: i32) -> (i32, i32, i32) {
    %c0_i32 = arith.constant 0 : i32
    %c0_i32_0 = arith.constant 0 : i32
    %c0_i32_1 = arith.constant 0 : i32
    return %arg1, %c0_i32, %c0_i32_0 : i32, i32, i32
  }
  func.func @transform_4(%arg0: i32, %arg1: i32) -> (i32, i32, i32) {
    %c0_i32 = arith.constant 0 : i32
    %c0_i32_0 = arith.constant 0 : i32
    %c0_i32_1 = arith.constant 0 : i32
    return %arg1, %c0_i32, %c0_i32_0 : i32, i32, i32
  }
  func.func @transform_5(%arg0: i32, %arg1: i32) -> (i32, i32) {
    %c0_i32 = arith.constant 0 : i32
    %c0_i32_0 = arith.constant 0 : i32
    %c0_i32_1 = arith.constant 0 : i32
    return %c0_i32, %c0_i32_0 : i32, i32
  }
  func.func @transform_6(%arg0: i32, %arg1: i32) -> (i32, i32, i32) {
    %c0_i32 = arith.constant 0 : i32
    %c0_i32_0 = arith.constant 0 : i32
    %c0_i32_1 = arith.constant 0 : i32
    return %arg0, %c0_i32, %c0_i32_0 : i32, i32, i32
  }
}

</mosaic_0001>

<bundles_post_ra>
// kernel: tpu_custom_call.1
= control target key start
LH: loop header
LB: loop body
LE: loop exit
PB: predicated region body
PF: predicated region fallthrough
CT: control target
= control target key end

     0   :  { %11 = vsyncpa [#allocation4], 0  ;;  %s1468_s0 = inlined_call_operand.vmem [shape: f32[2,8,32], index: 0, kind: input, shape index: {}]   ;;  %s1469_s1 = inlined_call_operand.vmem [shape: f32[4,32,8], index: 1, kind: input, shape index: {}]   ;;  %s1470_s2 = inlined_call_operand.vmem [shape: f32[4,32,8], index: 2, kind: input, shape index: {}]   ;;  %s1471_s3 = inlined_call_operand.vmem [shape: f32[4,32,8], index: 3, kind: input, shape index: {}]   ;;  %s1472_s4 = inlined_call_operand.vmem [shape: f32[4,8,32], index: 4, kind: input, shape index: {}]   ;;  %s1473_s5 = inlined_call_operand.vmem [shape: f32[1,32], index: 5, kind: input, shape index: {}]   ;;  %s1474_s6 = inlined_call_operand.hbm [shape: f32[2,8,32], index: 6, kind: output, shape index: {}]  }
   0x1   :  { %13 = vsyncpa [#allocation4 + $0x1], 0  ;;  %s1283_s21 = smov 0   ;;  %s1285_s22 = smov 0  }
   0x2   :  { %s1287_s23 = smov 0   ;;  %s1289_s24 = smov 0  }
   0x3   :  { %s1291_s25 = smov 0   ;;  %s1293_s26 = smov 0  }
   0x4   :  { %s1295_s27 = smov 0   ;;  %s1297_s28 = smov 0  }
   0x5 LB: > { %1482 = sst [smem:[#allocation6_spill]] %s1214_s21  ;;  %s952_s29 = sadd.s32 4294967295, %s1242_s28   ;;  %s1242_s28 = sphi %s1297_s28, %s19_s28   ;;  %s1238_s27 = sphi %s1295_s27, %s1500_s27   ;;  %s1234_s26 = sphi %s1293_s26, %s1504_s26   ;;  %s1230_s25 = sphi %s1291_s25, %s1498_s25   ;;  %s1226_s24 = sphi %s1289_s24, %s1497_s24   ;;  %s1222_s23 = sphi %s1287_s23, %s1503_s23   ;;  %s1218_s22 = sphi %s1285_s22, %s1502_s22   ;;  %s1214_s21 = sphi %s1283_s21, %s1501_s21  }
   0x6   : > { %1483 = sst [smem:[#allocation7_spill]] %s1222_s23  ;;  %s953_s30 = sadd.s32 4294967294, %s1242_s28  }
   0x7   : > { %1484 = sst [smem:[#allocation8_spill]] %s1234_s26  ;;  %s28_s7 = sadd.s32 1, %s1234_s26 }
   0x8   : > { %1485 = sst [smem:[#allocation9_spill]] %s1238_s27  ;;  %p29_p0 = scmp.ge.s32.totalorder %s28_s7, 4 }
   0x9   : > { %s31_s8 = sadd.s32 1, %s1238_s27  ;;  %p199_p1 = scmp.ne.s32.totalorder %s1222_s23, %s1218_s22 }
   0xa   : > { %p200_p2 = scmp.eq.s32.totalorder %s952_s29, 7  ;;  %s1506_s7 = smov (%p29_p0, %s28_s7), 0 }
   0xb   : > { %1486 = sst [smem:[#allocation10_spill]] %s1506_s7  ;;  %s1508_s8 = smov (!%p29_p0, %s31_s8), %s1238_s27 }
   0xc   : > { %p1332_p3 = por %p200_p2, %p199_p1  ;;  %p205_p4 = scmp.ne.s32.totalorder %s1218_s22, %s1214_s21 }
   0xd   : > { %p33_p5 = scmp.ge.s32.totalorder %s1508_s8, 2  ;;  %p206_p6 = scmp.eq.s32.totalorder %s953_s30, 7 }
   0xe   : > { %p956_p7 = scmp.ge.s32.totalorder %s1242_s28, 1  ;;  %p265_p8 = scmp.lt.s32.totalorder %s1242_s28, 9 }
   0xf   : > { %s1510_s8 = smov (%p33_p5, %s1508_s8), 0  ;;  %p1342_p9 = por %p206_p6, %p205_p4 }
  0x10   : > { %1488 = sst [smem:[#allocation11_spill]] %s1510_s8  ;;  %p266_p10 = pnand %p956_p7, %p265_p8 }
  0x11   : > { %s1489_s10 = scalar_select %p1342_p9, 1, 0 }
  0x12   : > { %s186_s11 = ssub.s32 %s1238_s27, %s1510_s8  ;;  %s189_s12 = sadd.s32 1, %s1222_s23 }
  0x13   : > { %1490 = sst [smem:[#allocation12_spill]] %s1489_s10  ;;  %p187_p11 = scmp.eq.s32.totalorder %s186_s11, 0 }
  0x14   : > { %269 = sbr.rel (%p266_p10) target bundleno = 1093 (0x445), region = 44  ;;  %s1477_s14 = sand.u32 (!%p266_p10), 1, %s1218_s22  }
  0x15   : > { %s1350_s13 = scalar_select %p187_p11, %s1222_s23, %s189_s12  }
  0x16   : > { %p313_p12 = scmp.lt.s32.totalorder (!%p266_p10), %s1230_s25, 1  ;;  %s1356_s15 = sshll.u32 (!%p266_p10), %s1477_s14, 3 }
  0x17   : > { %1491 = sst [smem:[#allocation13_spill]] %s1350_s13  ;;  %p317_p13 = scmp.lt.s32.totalorder (!%p266_p10), %s1226_s24, 3 }
  0x18   : > { %s312_s19 = scalar_lea.vmem (!%p266_p10), [#allocation3], %s1356_s15  ;;  %p966_p0 = scmp.ne.s32.totalorder (!%p266_p10), %s1226_s24, 0 }
  0x1b   : > { %s314_s16 = scalar_select %p313_p12, %s1230_s25, 1 }
  0x1c   : > { %s318_s17 = scalar_select %p317_p13, %s1226_s24, 3 }
  0x1d   : > { %s958_s18 = sshll.u32 %s314_s16, 3  ;;  %339 = sbr.rel (%p966_p0) target bundleno = 36 (0x24), region = 48  ;;  %v967_v0 = vld [vmem:[%s1473_s5] ss:$0 sm:$0xff] (!%p966_p0)  ;;  %vm347_vm0 = vcmask (!%p966_p0), 261120  }
  0x1e   : > { %s1364_s29 = scalar_lea.vmem %s1468_s0, %s958_s18  ;;  %s980_s30 = sshll.u32 %s318_s17, 5  ;;  %348 = vst.msk [vmem:[#allocation2] sm:$0xff] (!%p966_p0), %vm347_vm0, %v967_v0 }
  0x1f   : > { %s321_s8 = scalar_lea.vmem %s1469_s1, %s980_s30  ;;  %s326_s14 = scalar_lea.vmem %s1470_s2, %s980_s30 }
  0x20   : > { %s1375_s23 = scalar_lea.vmem %s1471_s3, %s980_s30  ;;  %s965_s16 = sshll.u32 %s318_s17, 3 }
  0x21   : > { %s1380_s18 = scalar_lea.vmem %s1472_s4, %s965_s16 }
  0x24 PF: > { %v428_v1 = vld [vmem:[%s326_s14] sm:$0xff]  ;;  %v429_v2 = vld [vmem:[%s326_s14 + $0x8] sm:$0xff]  ;;  %v1244_v4 = vmov 0.0|0.0   ;;  %v430_v7 = vld [vmem:[%s326_s14 + $0x10] sm:$0xff]  ;;  %vm1245_vm1 = vmmov 0   ;;  %v1246_v10 = vmov 0.0  }
  0x25   : > { %v350_v3 = vld [vmem:[%s321_s8] sm:$0xff]  ;;  %1058 = vmatprep.subr.bf16.mxu1 %v1244_v4  ;;  %v1059_v5 = vpack.c.bf16 %v429_v2, %v428_v1  ;;  %1052 = vmatprep.subr.bf16.mxu0 %v1244_v4  ;;  %v351_v6 = vld [vmem:[%s321_s8 + $0x8] sm:$0xff]  ;;  %v431_v8 = vld [vmem:[%s326_s14 + $0x18] sm:$0xff]  ;;  %vm354_vm2 = vcmask 261120   ;;  %vm576_vm3 = vcmask 64512   ;;  %p975_p1 = scmp.ne.s32.totalorder %s1226_s24, 3 }
  0x26   : > { %v1053_v9 = vpack.c.bf16 %v351_v6, %v350_v3  ;;  %1023 = vmatprep.mubr.msk.f32.mxu1 %vm1245_vm1, %v1246_v10  ;;  %v352_v11 = vld [vmem:[%s321_s8 + $0x10] sm:$0xff]  ;;  %v353_v12 = vld [vmem:[%s321_s8 + $0x18] sm:$0xff]  ;;  %1012 = vmatprep.mubr.msk.f32.mxu0 %vm1245_vm1, %v1246_v10  ;;  %v1062_v13 = vpack.c.bf16 %v431_v8, %v430_v7  ;;  %v349_v15 = vld [vmem:[%s1364_s29] sm:$0xff] }
  0x27   : > { %1060 = vmatpush3.bf16.msra.mxu1 %v1059_v5  ;;  %v1056_v14 = vpack.c.bf16 %v353_v12, %v352_v11  ;;  %v502_v16 = vld [vmem:[%s1375_s23] sm:$0xff]  ;;  %v503_v17 = vld [vmem:[%s1375_s23 + $0x8] sm:$0xff]  ;;  %v504_v18 = vld [vmem:[%s1375_s23 + $0x10] sm:$0xff] }
  0x28   : > { %1054 = vmatpush3.bf16.msra.mxu0 %v1053_v9  ;;  %1061 = vmatprep.subr.bf16.mxu1 %v1244_v4  ;;  %v1065_v19 = vpack.c.bf16 %v503_v17, %v502_v16  ;;  %v505_v20 = vld [vmem:[%s1375_s23 + $0x18] sm:$0xff]  ;;  %v738_v36 = vld [vmem:[%s1380_s18] sm:$0xff] }
  0x29   : > { %1055 = vmatprep.subr.bf16.mxu0 %v1244_v4  ;;  %v1068_v21 = vpack.c.bf16 %v505_v20, %v504_v18  ;;  %v737_v42 = vld [vmem:[#allocation2] sm:$0xff] }
  0x2b   : > { %1063 = vmatpush3.bf16.msra.mxu1 %v1062_v13 }
  0x2c   : > { %1057 = vmatpush3.bf16.msra.mxu0 %v1056_v14  ;;  %1037 = vmatprep.subr.mxu1 %v1246_v10 }
  0x2d   : > { %1064 = vmatprep.subr.bf16.mxu0 %v1244_v4 }
  0x2e   : > { %1024 = vmatmul.mubr.msk.f32.vlgmr.msra.gmra.mrb[0].mxu1 %vm354_vm2, %v349_v15 }
  0x2f   : > { %1013 = vmatmul.mubr.msk.f32.vlgmr.msra.gmra.mrb[0].mxu0 %vm354_vm2, %v349_v15  ;;  %1039 = vmatprep.mubr.msk.f32.mxu1 %vm1245_vm1, %v1246_v10 }
  0x30   : > { %1034 = vmatprep.mubr.msk.f32.mxu0 %vm1245_vm1, %v1246_v10  ;;  %1066 = vmatpush3.bf16.msra.mxu0 %v1065_v19 }
  0x31   : > { %1067 = vmatprep.subr.bf16.mxu0 %v1244_v4 }
  0x34   : > { %1069 = vmatpush3.bf16.msra.mxu0 %v1068_v21 }
  0x35   : > { %1047 = vmatprep.subr.mxu0 %v1246_v10 }
  0x37   : > { %1035 = vmatmul.mubr.msk.f32.vlgmr.msra.gmra.mrb[2].mxu0 %vm354_vm2, %v349_v15 }
  0x38   : > { %1049 = vmatprep.mubr.msk.f32.mxu0 %vm1245_vm1, %v1246_v10  ;;  %1048 = vmatpush3.msra.mxu0 %v738_v36 }
 0x101   : > { %v498_v22 = vpop.f32.mrb[0].mxu1 }
 0x102   : > { %v1025_v23 = vpop.f32.mrb[1].mxu1  ;;  %1038 = vmatpush3.xpose.msk.msra.mxu1 %vm576_vm3, %v498_v22  ;;  %v424_v24 = vpop.f32.mrb[0].mxu0 }
 0x103   : > { %v1014_v25 = vpop.f32.mrb[1].mxu0  ;;  %1042 = vmatprep.subr.mxu1 %v1246_v10 }
 0x105   : > { %1040 = vmatmul.mubr.msk.f32.vlgmr.msra.gmra.mrb[2].mxu1 %vm576_vm3, %v424_v24 }
 0x106   : > { %1044 = vmatprep.mubr.msk.f32.mxu1 %vm1245_vm1, %v1246_v10 }
 0x10a   : > { %v572_v29 = vpop.f32.mrb[2].mxu0 }
 0x10b   : > { %v1036_v30 = vpop.f32.mrb[3].mxu0  ;;  %1043 = vmatpush3.msra.mxu1 %v572_v29 }
 0x1d8   : > { %v649_v26 = vpop.f32.mrb[2].mxu1 }
 0x1d9   : > { %v1041_v27 = vpop.f32.mrb[3].mxu1  ;;  %v653_v28 = vsel %vm576_vm3, %v649_v26, -inf }
 0x1da   : > { %654 = vmax.xlane.f32.xlu0 %v653_v28 }
 0x267   : > { %v655_v31 = vpop.xlane.xlu0 %654 }
 0x268   : > { %v656_v32 = vsub.f32 %v649_v26, %v655_v31 }
 0x26a   : > { %v657_v33 = vmul.f32 1.442695, %v656_v32 }
 0x26c   : > { %1144 = vpow2.f32 %v657_v33 }
 0x276   : > { %v1145_v34 = vpop.eup %1144 }
 0x277   : > { %1045 = vmatmul.mubr.msk.f32.vlgmr.msra.gmra.mrb[4].mxu1 %vm576_vm3, %v1145_v34  ;;  %v659_v35 = vsel %vm576_vm3, %v1145_v34, 0.0 }
 0x278   : > { %660 = vadd.xlane.f32.xlu0 %v659_v35 }
 0x305   : > { %v661_v37 = vpop.xlane.xlu0 %660 }
 0x306   : > { %1146 = vrcp.f32 %v661_v37 }
 0x310   : > { %v1147_v38 = vpop.eup %1146 }
 0x34a   : > { %v731_v39 = vpop.f32.mrb[4].mxu1 }
 0x34b   : > { %v736_v40 = vmul.f32 %v1147_v38, %v731_v39  ;;  %v1046_v41 = vpop.f32.mrb[5].mxu1 }
 0x34d   : > { %1050 = vmatmul.mubr.msk.f32.vlgmr.msra.gmra.mrb[4].mxu0 %vm576_vm3, %v736_v40 }
 0x41d   : > { %817 = sbr.rel (%p975_p1) target bundleno = 1068 (0x42c), region = 52 }
 0x420   : > { %v808_v43 = vpop.f32.mrb[4].mxu0 }
 0x421   : > { %v812_v44 = vadd.f32 %v808_v43, %v737_v42  ;;  %v1051_v45 = vpop.f32.mrb[5].mxu0 }
 0x423   : > { %813 = vst.msk [vmem:[#allocation2] sm:$0xff] %vm354_vm2, %v812_v44 }
 0x42a   : > { %v818_v46 = vld [vmem:[#allocation2] sm:$0xff] }
 0x42b   : > { %819 = vst.msk [vmem:[%s312_s19] sm:$0xff] %vm354_vm2, %v818_v46 }
 0x42c PF: > { %s977_s21 = sshll.u32 %s1230_s25, 7  ;;  %s834_s7 = sshll.u32 %s312_s19, 4  ;;  %s835_s7 = int_to_ptr.vmem [resolvable:$true] %s834_s7 }
 0x42d   : > { %s1417_s27 = scalar_lea.hbm %s1474_s6, %s977_s21  ;;  %s1492_s24 = sand.u32 1, %s1218_s22  }
 0x42e   : > { %s821_s8 = scalar_lea.sflag [#allocation4], %s1492_s24  ;;  %s1148_s10 = scalar_lea.vmem %s835_s7, 128 }
 0x42f   : > { %p1149_p2 = scmp.ne.s32.totalorder %s835_s7, %s1148_s10  ;;  %s1247_s13 = smov [#allocation3]  }
 0x430   : > { %s1152_s14 = sshll.u32 %s1247_s13, 4  ;;  %s1153_s14 = int_to_ptr.vmem [resolvable:$false] %s1152_s14 }
 0x431   : > { %p1150_p4 = pnand %p1149_p2, %p1332_p3  ;;  %s1154_s17 = scalar_lea.vmem %s1153_s14, 256 }
 0x432   : > { %p1155_p6 = scmp.lt.s32.totalorder %s835_s7, %s1153_s14  ;;  %p1156_p7 = scmp.lt.s32.totalorder %s1154_s17, %s1148_s10 }
 0x433   : > { %p1151_p5 = pneg %p1150_p4 }
 0x434   : > { %p1157_p8 = por %p1156_p7, %p1155_p6 }
 0x436   : > { %p1158_p10 = pnand %p1157_p8, %p1151_p5 }
 0x438   : > { %1161 = shalt.err (!%p1158_p10)
}
 0x439   : > { %s1162_s25 = scalar_lea.hbm %s1417_s27, 128  ;;  %s1166_s30 = scalar_lea.hbm %s1474_s6, 256 }
 0x43a   : > { %p1163_p11 = scmp.ne.s32.totalorder %s1417_s27, %s1162_s25  ;;  %p1167_p0 = scmp.lt.u32.totalorder %s1417_s27, %s1474_s6 }
 0x43b   : > { %p1168_p1 = scmp.lt.u32.totalorder %s1166_s30, %s1162_s25  ;;  %p1170_p4 = scmp.lt.u32.totalorder %s1162_s25, %s1417_s27 }
 0x43c   : > { %p1164_p12 = pnand %p1163_p11, %p1332_p3 }
 0x43d   : > { %p1169_p2 = por %p1168_p1, %p1167_p0 }
 0x43e   : > { %p1165_p13 = pneg %p1164_p12 }
 0x43f   : > { %p1171_p5 = por %p1170_p4, %p1169_p2 }
 0x441   : > { %p1172_p6 = pnand %p1171_p5, %p1165_p13 }
 0x443   : > { %1175 = shalt.err (!%p1172_p6)
}
 0x444   : > { %1070 = dma.vmem_to_hbm [thread:$0]  (%p1332_p3), %s835_s7, 128, %s1417_s27, %s821_s8  }
 0x445 PF: > { %s1493_s18 = sld [smem:[#allocation6_spill]]  ;;  %p1076_p7 = scmp.ge.s32.totalorder %s1242_s28, 2 }
 0x447   : > { %p1073_p8 = pnand %p1076_p7, %p1342_p9 }
 0x44b   : > { %s846_s20 = sand.u32 1, %s1493_s18  }
 0x44c   : > { %s847_s11 = scalar_lea.sflag [#allocation4], %s846_s20 }
 0x44d   : > { %1209 = dma.done.wait (!%p1073_p8), %s847_s11, 128  }
 0x44e   : > { %1211 = vsyncadd (!%p1073_p8), %s847_s11, 4294967168  ;;  %s19_s28 = sadd.s32 1, %s1242_s28   ;;  %s1495_s23 = sld [smem:[#allocation7_spill]] }
 0x44f   : > { %p16_p10 = scmp.ge.s32.totalorder %s19_s28, 10   ;;  %s1496_s26 = sld [smem:[#allocation13_spill]] }
 0x450   : > { %s1497_s24 = sld [smem:[#allocation8_spill]]  ;;  %s1498_s25 = sld [smem:[#allocation9_spill]] }
 0x451   : > { %s1499_s9 = sld [smem:[#allocation10_spill]]  ;;  %s1500_s27 = sld [smem:[#allocation11_spill]] }
 0x452   : > { %s1501_s21 = smov %s1218_s22  ;;  %18 = sbr.rel (!%p16_p10) target bundleno = 5 (0x5), region = 99 }
 0x454   : > { %s1502_s22 = smov %s1495_s23 }
 0x455   : > { %s1503_s23 = smov %s1496_s26 }
 0x457   : > { %s1504_s26 = smov %s1499_s9 }
 0x459   :  { %852 = vsyncpa [#allocation4], 1 }
 0x45a   :  { %854 = vsyncpa [#allocation4 + $0x1], 1 }

</bundles_post_ra>
